<compile_context>
chip_gen: v7x
topology: tpu7x:2x2x1
jax: 0.10.0
libtpu: 0.0.40
codegen_flags: <defaults>
</compile_context>

<pallas_src>
import jax
import jax.numpy as jnp
from jax.experimental import pallas as pl
from jax.experimental.pallas import tpu as pltpu


def _copy_kernel(x_ref, o_ref):
    # Pure pass-through on the current tile.
    o_ref[...] = x_ref[...]


# ~4 MiB per tile: per-grid-step overhead (~0.35 us) becomes negligible and a
# mem-bound copy sits near HBM roofline; 4 x tile (double-buffered in + out)
# = 16 MiB, safe on every generation including v7x (64 MiB physical VMEM).
_TARGET_TILE_BYTES = 4 * 1024 * 1024
_VMEM_LIMIT_BYTES = 32 * 1024 * 1024  # 4 x tile + generous headroom


def _pallas_copy_2d(x2):
    """Tiled lane-dense copy of a 2-D array (rows, lanes)."""
    rows, lanes = x2.shape
    itemsize = jnp.dtype(x2.dtype).itemsize
    # Sublane packing: 8 rows for 4-byte dtypes, 16 for bf16, 32 for int8.
    sub = max(8, 32 // max(itemsize, 1))
    # Pick a block row count giving ~_TARGET_TILE_BYTES per tile, rounded to
    # the sublane pack so the block shape stays layout-legal.
    target_rows = max(sub, _TARGET_TILE_BYTES // max(lanes * itemsize, 1))
    target_rows = max(sub, (target_rows // sub) * sub)
    if rows % sub == 0 and rows > target_rows:
        block_rows = target_rows
    else:
        block_rows = rows  # full extent: always a legal block shape

    grid = (pl.cdiv(rows, block_rows),)
    return pl.pallas_call(
        _copy_kernel,
        out_shape=jax.ShapeDtypeStruct((rows, lanes), x2.dtype),
        grid_spec=pltpu.PrefetchScalarGridSpec(
            num_scalar_prefetch=0,
            grid=grid,
            in_specs=[pl.BlockSpec((block_rows, lanes), lambda i: (i, 0))],
            out_specs=pl.BlockSpec((block_rows, lanes), lambda i: (i, 0)),
        ),
        # Output aliases input: no second HBM buffer when the input can be
        # donated (inside a jit with donate_argnums); XLA copy-protects
        # automatically otherwise, so correctness is unaffected.
        input_output_aliases={0: 0},
        compiler_params=pltpu.CompilerParams(
            dimension_semantics=("parallel",),  # lets v7x split across 2 TCs
            vmem_limit_bytes=_VMEM_LIMIT_BYTES,
        ),
    )(x2)


def identity_forward(x, *, materialize=False):
    """Identity.forward: returns x.

    Default (materialize=False): return x directly -- the true optimum for an
    identity layer is no kernel and no HBM traffic at all.

    materialize=True: force a Pallas copy kernel (only useful if a distinct,
    materialized output buffer is genuinely required).  The copy is flattened
    to a lane-dense layout and tiled in multi-MiB blocks.
    """
    if not materialize:
        return x  # highest-value optimization: do nothing

    if x.size == 0:
        return x

    orig_shape = x.shape
    total = x.size
    flat = x.reshape(-1)

    # Re-tile as (rows, multiple-of-128) so DMA descriptors and vector stores
    # are full-lane dense (D=32-style layouts would waste 3/4 of every vreg).
    for lanes in (1024, 512, 256, 128):
        if total % lanes == 0:
            x2 = flat.reshape(total // lanes, lanes)
            break
    else:
        # TODO(synk): totals not divisible by 128 fall back to one full-extent
        # block (padding would add HBM traffic for a pure copy).
        x2 = flat.reshape(1, total)

    y2 = _pallas_copy_2d(x2)
    return y2.reshape(orig_shape)


if __name__ == "__main__":
    key = jax.random.PRNGKey(0)

    # Identity(d=32) applied to a (batch=8, d=32) input, as in the module.
    d = 32
    batch = 8
    x = jax.random.normal(key, (batch, d), dtype=jnp.float32)

    # Default path: pure pass-through, no kernel.
    y_fast = identity_forward(x)
    assert y_fast.shape == x.shape and y_fast.dtype == x.dtype
    assert bool(jnp.all(y_fast == x))

    # Kernel path: lane-dense, tiled, aliased Pallas copy.
    y = identity_forward(x, materialize=True)
    jax.block_until_ready(y)
    assert y.shape == x.shape and y.dtype == x.dtype
    assert bool(jnp.all(y == x))

    print("KERNEL_OK")
</pallas_src>

<mosaic_0001>
module attributes {stable_mosaic.version = 11 : i64} {
  func.func @_copy_kernel(%arg0: i32, %arg1: memref<1x256xf32, #tpu.memory_space<vmem>>, %arg2: memref<1x256xf32, #tpu.memory_space<vmem>>) attributes {dimension_semantics = [#tpu.dimension_semantics<parallel>], iteration_bounds = array<i64: 1>, scalar_prefetch = 0 : i64, scratch_operands = 0 : i64, tpu.core_type = #tpu.core_type<tc>, window_params = [{transform_indices = @transform_0, window_bounds = array<i64: 1, 256>}, {transform_indices = @transform_1, window_bounds = array<i64: 1, 256>}]} {
    %c0 = arith.constant 0 : index
    %c0_0 = arith.constant 0 : index
    %0 = vector.load %arg1[%c0, %c0_0] : memref<1x256xf32, #tpu.memory_space<vmem>>, vector<1x256xf32>
    %c0_1 = arith.constant 0 : index
    %c0_2 = arith.constant 0 : index
    %1 = vector.load %arg2[%c0_1, %c0_2] : memref<1x256xf32, #tpu.memory_space<vmem>>, vector<1x256xf32>
    tpu.vector_store %arg2[%c0_1, %c0_2], %0 {strides = array<i32>} : memref<1x256xf32, #tpu.memory_space<vmem>>, vector<1x256xf32>,
    return
  }
  func.func @transform_0(%arg0: i32) -> (i32, i32) {
    %c0_i32 = arith.constant 0 : i32
    %c0_i32_0 = arith.constant 0 : i32
    return %arg0, %c0_i32 : i32, i32
  }
  func.func @transform_1(%arg0: i32) -> (i32, i32) {
    %c0_i32 = arith.constant 0 : i32
    %c0_i32_0 = arith.constant 0 : i32
    return %arg0, %c0_i32 : i32, i32
  }
}

</mosaic_0001>

<bundles_post_ra>
// kernel: tpu_custom_call.1
= control target key start
LH: loop header
LB: loop body
LE: loop exit
PB: predicated region body
PF: predicated region fallthrough
CT: control target
= control target key end

     0   :  { %6 = vsyncpa [#allocation3], 0  ;;  %s128_s0 = inlined_call_operand.hbm [shape: f32[1,256], index: 0, kind: input, shape index: {}, may-alias: {0,1}]   ;;  %s129_s1 = inlined_call_operand.hbm [shape: f32[1,256], index: 1, kind: output, shape index: {}, may-alias: {0,1}]  }
   0x1   :  { %7 = vsyncpa [#allocation4], 0  ;;  %s92_s6 = smov [#allocation2]   ;;  %s44_s10 = scalar_lea.hbm %s128_s0, 32 }
   0x2   :  { %s14_s7 = sshll.u32 %s92_s6, 4  ;;  %p45_p0 = scmp.ne.s32.totalorder %s128_s0, %s44_s10  ;;  %s15_s7 = int_to_ptr.vmem [resolvable:$true] %s14_s7 }
   0x3   :  { %p48_p1 = scmp.lt.u32.totalorder %s44_s10, %s128_s0 }
   0x5   :  { %p50_p2 = pnand %p48_p1, %p45_p0 }
   0x7   :  { %53 = shalt.err (!%p50_p2)
}
   0x8   :  { %s54_s15 = scalar_lea.vmem %s15_s7, 32  ;;  %p59_p4 = scmp.lt.s32.totalorder %s15_s7, %s15_s7 }
   0x9   :  { %p55_p3 = scmp.ne.s32.totalorder %s15_s7, %s54_s15  ;;  %p60_p5 = scmp.lt.s32.totalorder %s54_s15, %s54_s15 }
   0xb   :  { %p61_p6 = por %p60_p5, %p59_p4 }
   0xd   :  { %p62_p7 = pnand %p61_p6, %p55_p3 }
   0xf   :  { %65 = shalt.err (!%p62_p7)
}
  0x10   :  { %17 = dma.hbm_to_vmem [thread:$0]  %s128_s0, 32, %s15_s7, [#allocation3]  }
  0x11   :  { %88 = dma.done.wait [#allocation3], 32  }
  0x12   :  { %89 = vsyncadd [#allocation3], 4294967264  ;;  %v22_v0 = vlaneseq  ;;  %s93_s18 = smov [#allocation5]   ;;  %v21_v1 = vld [vmem:[#allocation2] sm:$0x3] }
  0x13   :  { %s33_s19 = sshll.u32 %s93_s18, 4  ;;  %s34_s19 = int_to_ptr.vmem [resolvable:$true] %s33_s19 }
  0x14   :  { %vm24_vm0 = vcmp.lt.s32.totalorder %v22_v0, 256  ;;  %s66_s20 = scalar_lea.vmem %s34_s19, 32  ;;  %p71_p9 = scmp.lt.s32.totalorder %s34_s19, %s34_s19 }
  0x15   :  { %26 = vst.msk [vmem:[#allocation5] sm:$0x3] %vm24_vm0, %v21_v1  ;;  %p67_p8 = scmp.ne.s32.totalorder %s34_s19, %s66_s20  ;;  %p72_p10 = scmp.lt.s32.totalorder %s66_s20, %s66_s20 }
  0x17   :  { %p73_p11 = por %p72_p10, %p71_p9 }
  0x19   :  { %p74_p12 = pnand %p73_p11, %p67_p8 }
  0x1b   :  { %77 = shalt.err (!%p74_p12)
}
  0x1c   :  { %s78_s0 = scalar_lea.hbm %s129_s1, 32 }
  0x1d   :  { %p79_p13 = scmp.ne.s32.totalorder %s129_s1, %s78_s0  ;;  %p82_p0 = scmp.lt.u32.totalorder %s78_s0, %s129_s1 }
  0x1f   :  { %p84_p1 = pnand %p82_p0, %p79_p13 }
  0x21   :  { %87 = shalt.err (!%p84_p1)
}
  0x22   :  { %36 = dma.vmem_to_hbm [thread:$0]  %s34_s19, 32, %s129_s1, [#allocation4]  }
  0x23   :  { %90 = dma.done.wait [#allocation4], 32  }
  0x24   :  { %91 = vsyncadd [#allocation4], 4294967264 }
  0x25   :  { %40 = vsyncpa [#allocation3], 1 }
  0x26   :  { %41 = vsyncpa [#allocation4], 1 }

</bundles_post_ra>
